<compile_context>
chip_gen: v7x
topology: tpu7x:2x2x1
jax: 0.10.0
libtpu: 0.0.40
codegen_flags: <defaults>
</compile_context>

<pallas_src>
import functools

import numpy as np
import jax
import jax.numpy as jnp
from jax import lax
from jax.experimental import pallas as pl
from jax.experimental.pallas import tpu as pltpu


def _resblock_kernel(x_ref, m_ref, gc_ref, p_ref, alpha_ref, out_ref, *, H):
    eps = 1e-5
    NH, WC = x_ref.shape

    x = x_ref[...]                     # (N*H, W*C) f32, lane-dense
    Gc = gc_ref[...]                   # (W*C, W*C) channel-grouping matrix / count
    p = p_ref[...]                     # (4, W*C): gamma1, beta1, gamma2, beta2
    g1, b1, g2, b2 = p[0:1, :], p[1:2, :], p[2:3, :], p[3:4, :]
    alpha = alpha_ref[0]               # scalar read from SMEM

    # Batch-boundary (padding=1 halo) masks for the dy = +/-1 row shifts.
    hh = lax.broadcasted_iota(jnp.int32, (NH, 1), 0) % H
    not_top = (hh != 0).astype(jnp.float32)        # zero where h == 0
    not_bot = (hh != H - 1).astype(jnp.float32)    # zero where h == H-1

    def conv3x3(z, m):
        # dy shifts on the XLU (roll) + VPU mask; all three dy taps fused into
        # one MXU matmul against the pre-stacked (3*W*C, W*C) weight matrix.
        z_up = pltpu.roll(z, 1, axis=0) * not_top        # row h-1
        z_dn = pltpu.roll(z, NH - 1, axis=0) * not_bot   # row h+1
        lhs = jnp.concatenate([z_up, z, z_dn], axis=1)   # (N*H, 3*W*C)
        return jnp.dot(lhs, m, preferred_element_type=jnp.float32)

    def batchnorm(y, g, b):
        # Single-pass biased batch stats: E[y] and E[y^2] reduced over the
        # batch and over width positions (and broadcast back to all lanes)
        # with one small matmul; var = E[y^2] - E[y]^2.
        s = jnp.concatenate(
            [jnp.sum(y, axis=0, keepdims=True),
             jnp.sum(y * y, axis=0, keepdims=True)], axis=0)      # (2, W*C)
        red = jnp.dot(s, Gc, preferred_element_type=jnp.float32)  # (2, W*C)
        mean = red[0:1, :]
        var = red[1:2, :] - mean * mean
        scale = lax.rsqrt(var + eps) * g                          # (1, W*C)
        shift = b - mean * scale                                  # (1, W*C)
        return y * scale + shift

    # conv1 -> bn1 -> prelu
    y = conv3x3(x, m_ref[0])
    y = batchnorm(y, g1, b1)
    y = jnp.where(y > 0, y, alpha * y)

    # conv2 -> bn2 (intermediate stays resident)
    y = conv3x3(y, m_ref[1])
    y = batchnorm(y, g2, b2)

    # residual add, lane-dense unmasked store
    out_ref[...] = (x + y).astype(out_ref.dtype)


def _fold_conv_taps_stacked(w_hwio, W, C):
    """(3, 3, Cin, Cout) -> (3*W*C, W*C): width taps folded into block-banded
    matrices, the three dy taps stacked along K."""
    w = np.asarray(w_hwio, dtype=np.float32)
    WC = W * C
    M = np.zeros((3, WC, WC), dtype=np.float32)
    for ky in range(3):
        for w_out in range(W):
            for kx in range(3):
                w_in = w_out + kx - 1
                if 0 <= w_in < W:
                    M[ky, w_in * C:(w_in + 1) * C,
                          w_out * C:(w_out + 1) * C] = w[ky, kx]
    return M.reshape(3 * WC, WC)


def residual_block(x_nhwc, w1_hwio, gamma1, beta1, alpha, w2_hwio, gamma2, beta2):
    """x_nhwc: (N, H, W, C) float32; conv weights HWIO (3, 3, C, C)."""
    N, H, W, C = x_nhwc.shape
    NH, WC = N * H, W * C
    # Single-block lane-dense kernel assumptions (see TODO for the tiled version).
    assert WC % 128 == 0, f"W*C = {WC} must be a multiple of 128 (lane width)"
    assert NH % 8 == 0, f"N*H = {NH} must be a multiple of 8 (sublane width)"

    x2d = x_nhwc.reshape(NH, WC).astype(jnp.float32)

    # Stacked conv weights for both convs: (2, 3*W*C, W*C).
    m_stacked = jnp.asarray(np.stack(
        [_fold_conv_taps_stacked(w1_hwio, W, C),
         _fold_conv_taps_stacked(w2_hwio, W, C)], axis=0))

    # Channel-grouping matrix with 1/count pre-folded: Gc[i,j] = [i%C == j%C] / count.
    idx = np.arange(WC)
    gc = jnp.asarray(((idx[:, None] % C) == (idx[None, :] % C))
                     .astype(np.float32) / float(N * H * W))

    # Coalesced per-channel affine params, pre-tiled to the (W*C,) lane layout.
    params = jnp.stack([
        jnp.tile(gamma1.astype(jnp.float32), W),
        jnp.tile(beta1.astype(jnp.float32), W),
        jnp.tile(gamma2.astype(jnp.float32), W),
        jnp.tile(beta2.astype(jnp.float32), W)], axis=0)          # (4, W*C)

    a = jnp.asarray(alpha, jnp.float32).reshape(1)

    vmem = pl.BlockSpec(memory_space=pltpu.MemorySpace.VMEM)
    smem = pl.BlockSpec(memory_space=pltpu.MemorySpace.SMEM)

    kernel = functools.partial(_resblock_kernel, H=H)

    out2d = pl.pallas_call(
        kernel,
        out_shape=jax.ShapeDtypeStruct((NH, WC), jnp.float32),
        in_specs=[vmem, vmem, vmem, vmem, smem],
        out_specs=vmem,
        compiler_params=pltpu.CompilerParams(vmem_limit_bytes=32 * 1024 * 1024),
    )(x2d, m_stacked, gc, params, a)

    return out2d.reshape(N, H, W, C)


def _reference(x_nhwc, w1_hwio, gamma1, beta1, alpha, w2_hwio, gamma2, beta2):
    eps = 1e-5

    def conv(x, w):
        return lax.conv_general_dilated(
            x, w, window_strides=(1, 1), padding="SAME",
            dimension_numbers=("NHWC", "HWIO", "NHWC"),
            precision=lax.Precision.HIGHEST)

    def bn(y, g, b):
        mean = y.mean(axis=(0, 1, 2), keepdims=True)
        var = ((y - mean) ** 2).mean(axis=(0, 1, 2), keepdims=True)
        return (y - mean) / jnp.sqrt(var + eps) * g.reshape(1, 1, 1, -1) + b.reshape(1, 1, 1, -1)

    r = conv(x_nhwc, w1_hwio)
    r = bn(r, gamma1, beta1)
    r = jnp.where(r > 0, r, alpha * r)
    r = conv(r, w2_hwio)
    r = bn(r, gamma2, beta2)
    return x_nhwc + r


if __name__ == "__main__":
    # Small shapes consistent with the module; W * C = 128 -> lane-dense slab (32, 128).
    N, C, H, W = 2, 8, 16, 16
    key = jax.random.PRNGKey(0)
    k_x, k_w1, k_w2, k_g1, k_b1, k_g2, k_b2 = jax.random.split(key, 7)

    x_nchw = jax.random.normal(k_x, (N, C, H, W), jnp.float32)
    x_nhwc = jnp.transpose(x_nchw, (0, 2, 3, 1))

    # Deterministic parameter init (shapes from nn.Conv2d / nn.BatchNorm2d / nn.PReLU).
    fan_in = C * 3 * 3
    w1_oihw = jax.random.normal(k_w1, (C, C, 3, 3), jnp.float32) * (1.0 / fan_in) ** 0.5
    w2_oihw = jax.random.normal(k_w2, (C, C, 3, 3), jnp.float32) * (1.0 / fan_in) ** 0.5
    w1_hwio = jnp.transpose(w1_oihw, (2, 3, 1, 0))   # (3, 3, Cin, Cout)
    w2_hwio = jnp.transpose(w2_oihw, (2, 3, 1, 0))
    gamma1 = 1.0 + 0.1 * jax.random.normal(k_g1, (C,), jnp.float32)
    beta1 = 0.1 * jax.random.normal(k_b1, (C,), jnp.float32)
    gamma2 = 1.0 + 0.1 * jax.random.normal(k_g2, (C,), jnp.float32)
    beta2 = 0.1 * jax.random.normal(k_b2, (C,), jnp.float32)
    alpha = jnp.float32(0.25)   # nn.PReLU() default

    out = residual_block(x_nhwc, w1_hwio, gamma1, beta1, alpha, w2_hwio, gamma2, beta2)
    out = jax.block_until_ready(out)

    ref = _reference(x_nhwc, w1_hwio, gamma1, beta1, alpha, w2_hwio, gamma2, beta2)
    ref = jax.block_until_ready(ref)

    max_err = float(jnp.max(jnp.abs(out - ref)))
    assert max_err < 1e-3, f"mismatch vs reference: max abs err {max_err}"
    print("KERNEL_OK")
</pallas_src>

<mosaic_0001>
module attributes {stable_mosaic.version = 11 : i64} {
  func.func @_resblock_kernel(%arg0: memref<32x128xf32, #tpu.memory_space<vmem>>, %arg1: memref<2x384x128xf32, #tpu.memory_space<vmem>>, %arg2: memref<128x128xf32, #tpu.memory_space<vmem>>, %arg3: memref<4x128xf32, #tpu.memory_space<vmem>>, %arg4: memref<1xf32, #tpu.memory_space<smem>>, %arg5: memref<32x128xf32, #tpu.memory_space<vmem>>) attributes {dimension_semantics = [], scalar_prefetch = 0 : i64, scratch_operands = 0 : i64, tpu.core_type = #tpu.core_type<tc>} {
    %c0 = arith.constant 0 : index
    %c0_0 = arith.constant 0 : index
    %0 = vector.load %arg0[%c0, %c0_0] : memref<32x128xf32, #tpu.memory_space<vmem>>, vector<32x128xf32>
    %c0_1 = arith.constant 0 : index
    %c0_2 = arith.constant 0 : index
    %1 = vector.load %arg2[%c0_1, %c0_2] : memref<128x128xf32, #tpu.memory_space<vmem>>, vector<128x128xf32>
    %c0_3 = arith.constant 0 : index
    %c0_4 = arith.constant 0 : index
    %2 = vector.load %arg3[%c0_3, %c0_4] : memref<4x128xf32, #tpu.memory_space<vmem>>, vector<4x128xf32>
    %3 = vector.extract_strided_slice %2 {offsets = [0, 0], sizes = [1, 128], strides = [1, 1]} : vector<4x128xf32> to vector<1x128xf32>
    %4 = vector.extract_strided_slice %2 {offsets = [1, 0], sizes = [1, 128], strides = [1, 1]} : vector<4x128xf32> to vector<1x128xf32>
    %5 = vector.extract_strided_slice %2 {offsets = [2, 0], sizes = [1, 128], strides = [1, 1]} : vector<4x128xf32> to vector<1x128xf32>
    %6 = vector.extract_strided_slice %2 {offsets = [3, 0], sizes = [1, 128], strides = [1, 1]} : vector<4x128xf32> to vector<1x128xf32>
    %c0_5 = arith.constant 0 : index
    %7 = memref.load %arg4[%c0_5] : memref<1xf32, #tpu.memory_space<smem>>
    %8 = tpu.iota {dimensions = array<i32: 0>} : vector<32x1xi32>
    %c16_i32 = arith.constant 16 : i32
    %c0_i32 = arith.constant 0 : i32
    %9 = arith.cmpi eq, %c16_i32, %c0_i32 : i32
    %c1_i32 = arith.constant 1 : i32
    %10 = arith.select %9, %c1_i32, %c16_i32 : i32
    %11 = vector.broadcast %10 : i32 to vector<32x1xi32>
    %12 = arith.remsi %8, %11 : vector<32x1xi32>
    %c0_i32_6 = arith.constant 0 : i32
    %13 = vector.broadcast %c0_i32_6 : i32 to vector<32x1xi32>
    %14 = arith.cmpi ne, %12, %13 : vector<32x1xi32>
    %c0_i32_7 = arith.constant 0 : i32
    %15 = vector.broadcast %c0_i32_7 : i32 to vector<32x1xi32>
    %16 = arith.cmpi slt, %12, %15 : vector<32x1xi32>
    %c0_i32_8 = arith.constant 0 : i32
    %17 = arith.cmpi slt, %10, %c0_i32_8 : i32
    %18 = vector.broadcast %17 : i1 to vector<32x1xi1>
    %19 = vector.broadcast %18 : vector<32x1xi1> to vector<32x1xi1>
    %20 = arith.xori %16, %19 : vector<32x1xi1>
    %21 = arith.andi %20, %14 : vector<32x1xi1>
    %22 = vector.broadcast %10 : i32 to vector<32x1xi32>
    %23 = arith.addi %12, %22 : vector<32x1xi32>
    %24 = arith.select %21, %23, %12 : vector<32x1xi1>, vector<32x1xi32>
    %c0_i32_9 = arith.constant 0 : i32
    %25 = vector.broadcast %c0_i32_9 : i32 to vector<32x1xi32>
    %26 = arith.cmpi ne, %24, %25 : vector<32x1xi32>
    %27 = arith.extui %26 : vector<32x1xi1> to vector<32x1xi32>
    %28 = arith.sitofp %27 : vector<32x1xi32> to vector<32x1xf32>
    %c15_i32 = arith.constant 15 : i32
    %29 = vector.broadcast %c15_i32 : i32 to vector<32x1xi32>
    %30 = arith.cmpi ne, %24, %29 : vector<32x1xi32>
    %31 = arith.extui %30 : vector<32x1xi1> to vector<32x1xi32>
    %32 = arith.sitofp %31 : vector<32x1xi32> to vector<32x1xf32>
    %c0_10 = arith.constant 0 : index
    %c0_11 = arith.constant 0 : index
    %c0_12 = arith.constant 0 : index
    %33 = vector.load %arg1[%c0_10, %c0_11, %c0_12] : memref<2x384x128xf32, #tpu.memory_space<vmem>>, vector<1x384x128xf32>
    %34 = vector.shape_cast %33 : vector<1x384x128xf32> to vector<384x128xf32>
    %c1_i32_13 = arith.constant 1 : i32
    %35 = tpu.dynamic_rotate %0 by %c1_i32_13 dim 0 : vector<32x128xf32>, i32 -> vector<32x128xf32>
    %36 = vector.broadcast %28 : vector<32x1xf32> to vector<32x128xf32>
    %37 = arith.mulf %35, %36 : vector<32x128xf32>
    %c31_i32 = arith.constant 31 : i32
    %38 = tpu.dynamic_rotate %0 by %c31_i32 dim 0 : vector<32x128xf32>, i32 -> vector<32x128xf32>
    %39 = vector.broadcast %32 : vector<32x1xf32> to vector<32x128xf32>
    %40 = arith.mulf %38, %39 : vector<32x128xf32>
    %41 = tpu.concatenate %37, %0, %40 in 1 : vector<32x128xf32>, vector<32x128xf32>, vector<32x128xf32> -> vector<32x384xf32>
    %cst = arith.constant dense<0.000000e+00> : vector<32x128xf32>
    %42 = tpu.matmul %41, %34, %cst {dimension_numbers = #tpu.dot_dimension_numbers<[1], [0], [0], [1], [0, 0, 1, 1], [], []>} : vector<32x384xf32>, vector<384x128xf32>, vector<32x128xf32> -> vector<32x128xf32>
    %cst_14 = arith.constant dense<0.000000e+00> : vector<128xf32>
    %43 = vector.multi_reduction <add>, %42, %cst_14 [0] : vector<32x128xf32> to vector<128xf32>
    %44 = vector.shape_cast %43 : vector<128xf32> to vector<1x128xf32>
    %45 = arith.mulf %42, %42 : vector<32x128xf32>
    %cst_15 = arith.constant dense<0.000000e+00> : vector<128xf32>
    %46 = vector.multi_reduction <add>, %45, %cst_15 [0] : vector<32x128xf32> to vector<128xf32>
    %47 = vector.shape_cast %46 : vector<128xf32> to vector<1x128xf32>
    %48 = tpu.concatenate %44, %47 in 0 : vector<1x128xf32>, vector<1x128xf32> -> vector<2x128xf32>
    %cst_16 = arith.constant dense<0.000000e+00> : vector<2x128xf32>
    %49 = tpu.matmul %48, %1, %cst_16 {dimension_numbers = #tpu.dot_dimension_numbers<[1], [0], [0], [1], [0, 0, 1, 1], [], []>} : vector<2x128xf32>, vector<128x128xf32>, vector<2x128xf32> -> vector<2x128xf32>
    %50 = vector.extract_strided_slice %49 {offsets = [0, 0], sizes = [1, 128], strides = [1, 1]} : vector<2x128xf32> to vector<1x128xf32>
    %51 = vector.extract_strided_slice %49 {offsets = [1, 0], sizes = [1, 128], strides = [1, 1]} : vector<2x128xf32> to vector<1x128xf32>
    %52 = arith.mulf %50, %50 : vector<1x128xf32>
    %53 = arith.subf %51, %52 : vector<1x128xf32>
    %cst_17 = arith.constant 9.99999974E-6 : f32
    %54 = vector.broadcast %cst_17 : f32 to vector<1x128xf32>
    %55 = arith.addf %53, %54 : vector<1x128xf32>
    %56 = math.rsqrt %55 : vector<1x128xf32>
    %57 = arith.mulf %56, %3 : vector<1x128xf32>
    %58 = arith.mulf %50, %57 : vector<1x128xf32>
    %59 = arith.subf %4, %58 : vector<1x128xf32>
    %60 = vector.broadcast %57 : vector<1x128xf32> to vector<32x128xf32>
    %61 = arith.mulf %42, %60 : vector<32x128xf32>
    %62 = vector.broadcast %59 : vector<1x128xf32> to vector<32x128xf32>
    %63 = arith.addf %61, %62 : vector<32x128xf32>
    %cst_18 = arith.constant 0.000000e+00 : f32
    %64 = vector.broadcast %cst_18 : f32 to vector<32x128xf32>
    %65 = arith.cmpf ogt, %63, %64 : vector<32x128xf32>
    %66 = vector.broadcast %7 : f32 to vector<32x128xf32>
    %67 = arith.mulf %66, %63 : vector<32x128xf32>
    %68 = arith.select %65, %63, %67 : vector<32x128xi1>, vector<32x128xf32>
    %c1 = arith.constant 1 : index
    %c0_19 = arith.constant 0 : index
    %c0_20 = arith.constant 0 : index
    %69 = vector.load %arg1[%c1, %c0_19, %c0_20] : memref<2x384x128xf32, #tpu.memory_space<vmem>>, vector<1x384x128xf32>
    %70 = vector.shape_cast %69 : vector<1x384x128xf32> to vector<384x128xf32>
    %c1_i32_21 = arith.constant 1 : i32
    %71 = tpu.dynamic_rotate %68 by %c1_i32_21 dim 0 : vector<32x128xf32>, i32 -> vector<32x128xf32>
    %72 = vector.broadcast %28 : vector<32x1xf32> to vector<32x128xf32>
    %73 = arith.mulf %71, %72 : vector<32x128xf32>
    %c31_i32_22 = arith.constant 31 : i32
    %74 = tpu.dynamic_rotate %68 by %c31_i32_22 dim 0 : vector<32x128xf32>, i32 -> vector<32x128xf32>
    %75 = vector.broadcast %32 : vector<32x1xf32> to vector<32x128xf32>
    %76 = arith.mulf %74, %75 : vector<32x128xf32>
    %77 = tpu.concatenate %73, %68, %76 in 1 : vector<32x128xf32>, vector<32x128xf32>, vector<32x128xf32> -> vector<32x384xf32>
    %cst_23 = arith.constant dense<0.000000e+00> : vector<32x128xf32>
    %78 = tpu.matmul %77, %70, %cst_23 {dimension_numbers = #tpu.dot_dimension_numbers<[1], [0], [0], [1], [0, 0, 1, 1], [], []>} : vector<32x384xf32>, vector<384x128xf32>, vector<32x128xf32> -> vector<32x128xf32>
    %cst_24 = arith.constant dense<0.000000e+00> : vector<128xf32>
    %79 = vector.multi_reduction <add>, %78, %cst_24 [0] : vector<32x128xf32> to vector<128xf32>
    %80 = vector.shape_cast %79 : vector<128xf32> to vector<1x128xf32>
    %81 = arith.mulf %78, %78 : vector<32x128xf32>
    %cst_25 = arith.constant dense<0.000000e+00> : vector<128xf32>
    %82 = vector.multi_reduction <add>, %81, %cst_25 [0] : vector<32x128xf32> to vector<128xf32>
    %83 = vector.shape_cast %82 : vector<128xf32> to vector<1x128xf32>
    %84 = tpu.concatenate %80, %83 in 0 : vector<1x128xf32>, vector<1x128xf32> -> vector<2x128xf32>
    %cst_26 = arith.constant dense<0.000000e+00> : vector<2x128xf32>
    %85 = tpu.matmul %84, %1, %cst_26 {dimension_numbers = #tpu.dot_dimension_numbers<[1], [0], [0], [1], [0, 0, 1, 1], [], []>} : vector<2x128xf32>, vector<128x128xf32>, vector<2x128xf32> -> vector<2x128xf32>
    %86 = vector.extract_strided_slice %85 {offsets = [0, 0], sizes = [1, 128], strides = [1, 1]} : vector<2x128xf32> to vector<1x128xf32>
    %87 = vector.extract_strided_slice %85 {offsets = [1, 0], sizes = [1, 128], strides = [1, 1]} : vector<2x128xf32> to vector<1x128xf32>
    %88 = arith.mulf %86, %86 : vector<1x128xf32>
    %89 = arith.subf %87, %88 : vector<1x128xf32>
    %cst_27 = arith.constant 9.99999974E-6 : f32
    %90 = vector.broadcast %cst_27 : f32 to vector<1x128xf32>
    %91 = arith.addf %89, %90 : vector<1x128xf32>
    %92 = math.rsqrt %91 : vector<1x128xf32>
    %93 = arith.mulf %92, %5 : vector<1x128xf32>
    %94 = arith.mulf %86, %93 : vector<1x128xf32>
    %95 = arith.subf %6, %94 : vector<1x128xf32>
    %96 = vector.broadcast %93 : vector<1x128xf32> to vector<32x128xf32>
    %97 = arith.mulf %78, %96 : vector<32x128xf32>
    %98 = vector.broadcast %95 : vector<1x128xf32> to vector<32x128xf32>
    %99 = arith.addf %97, %98 : vector<32x128xf32>
    %100 = arith.addf %0, %99 : vector<32x128xf32>
    %c0_28 = arith.constant 0 : index
    %c0_29 = arith.constant 0 : index
    %101 = vector.load %arg5[%c0_28, %c0_29] : memref<32x128xf32, #tpu.memory_space<vmem>>, vector<32x128xf32>
    tpu.vector_store %arg5[%c0_28, %c0_29], %100 {strides = array<i32>} : memref<32x128xf32, #tpu.memory_space<vmem>>, vector<32x128xf32>,
    return
  }
}

</mosaic_0001>

<bundles_post_ra>
// kernel: tpu_custom_call.1
= control target key start
LH: loop header
LB: loop body
LE: loop exit
PB: predicated region body
PF: predicated region fallthrough
CT: control target
= control target key end

     0   :  { %11 = vsyncpa [#allocation4], 0  ;;  %s1830_s0 = inlined_call_operand.hbm [shape: f32[32,128], index: 0, kind: input, shape index: {}]   ;;  %s1831_s1 = inlined_call_operand.hbm [shape: f32[2,384,128], index: 1, kind: input, shape index: {}]   ;;  %s1832_s2 = inlined_call_operand.hbm [shape: f32[128,128], index: 2, kind: input, shape index: {}]   ;;  %s1833_s3 = inlined_call_operand.vmem [shape: f32[4,128], index: 3, kind: input, shape index: {}]   ;;  %s1834_s4 = inlined_call_operand.<no memory space> [shape: f32[1], index: 4, kind: input, shape index: {}]   ;;  %s1835_s5 = inlined_call_operand.hbm [shape: f32[32,128], index: 5, kind: output, shape index: {}]  }
   0x1   :  { %12 = vsyncpa [#allocation7], 0 }
   0x2   :  { %13 = vsyncpa [#allocation5], 0  ;;  %s1539_s18 = smov [#allocation6]   ;;  %s1540_s20 = smov [#allocation3]  }
   0x3   :  { %s31_s19 = sshll.u32 %s1539_s18, 4  ;;  %s19_s21 = sshll.u32 %s1540_s20, 4  ;;  %s32_s19 = int_to_ptr.vmem [resolvable:$true] %s31_s19  ;;  %s1578_s21 = int_to_ptr.vmem [resolvable:$true] %s19_s21 }
   0x4   :  { %s1445_s24 = scalar_lea.hbm %s1831_s1, 12288 }
   0x5   :  { %p1446_p0 = scmp.ne.s32.totalorder %s1831_s1, %s1445_s24  ;;  %p1449_p1 = scmp.lt.u32.totalorder %s1445_s24, %s1831_s1 }
   0x7   :  { %p1451_p2 = pnand %p1449_p1, %p1446_p0 }
   0x9   :  { %1454 = shalt.err (!%p1451_p2)
}
   0xa   :  { %s1455_s29 = scalar_lea.vmem %s32_s19, 12288  ;;  %p1460_p4 = scmp.lt.s32.totalorder %s32_s19, %s32_s19 }
   0xb   :  { %p1456_p3 = scmp.ne.s32.totalorder %s32_s19, %s1455_s29  ;;  %p1461_p5 = scmp.lt.s32.totalorder %s1455_s29, %s1455_s29 }
   0xd   :  { %p1462_p6 = por %p1461_p5, %p1460_p4 }
   0xf   :  { %p1463_p7 = pnand %p1462_p6, %p1456_p3 }
  0x11   :  { %1466 = shalt.err (!%p1463_p7)
}
  0x12   :  { %s1541_s30 = smov 128   ;;  %s1542_s6 = smov 8  }
  0x13   :  { %37 = dma.hbm_to_vmem [thread:$0]  %s1831_s1, 12288, %s32_s19, [#allocation7], %s1541_s30, %s1541_s30, %s1542_s6  }
  0x14   :  { %s1467_s11 = scalar_lea.hbm %s1830_s0, 512 }
  0x15   :  { %p1468_p8 = scmp.ne.s32.totalorder %s1830_s0, %s1467_s11  ;;  %p1471_p9 = scmp.lt.u32.totalorder %s1467_s11, %s1830_s0 }
  0x17   :  { %p1473_p10 = pnand %p1471_p9, %p1468_p8 }
  0x19   :  { %1476 = shalt.err (!%p1473_p10)
}
  0x1a   :  { %s1477_s16 = scalar_lea.vmem %s1578_s21, 512  ;;  %p1482_p12 = scmp.lt.s32.totalorder %s1578_s21, %s1578_s21 }
  0x1b   :  { %p1478_p11 = scmp.ne.s32.totalorder %s1578_s21, %s1477_s16  ;;  %p1483_p13 = scmp.lt.s32.totalorder %s1477_s16, %s1477_s16 }
  0x1d   :  { %p1484_p0 = por %p1483_p13, %p1482_p12 }
  0x1f   :  { %p1485_p1 = pnand %p1484_p0, %p1478_p11 }
  0x21   :  { %1488 = shalt.err (!%p1485_p1)
}
  0x22   :  { %25 = dma.hbm_to_vmem [thread:$0]  %s1830_s0, 512, %s1578_s21, [#allocation4], %s1541_s30, %s1541_s30, %s1542_s6  }
  0x23   :  { %s1543_s18 = smov [#allocation8]   ;;  %s1489_s23 = scalar_lea.hbm %s1832_s2, 2048 }
  0x24   :  { %s43_s19 = sshll.u32 %s1543_s18, 4  ;;  %p1490_p2 = scmp.ne.s32.totalorder %s1832_s2, %s1489_s23  ;;  %s44_s19 = int_to_ptr.vmem [resolvable:$true] %s43_s19 }
  0x25   :  { %p1493_p3 = scmp.lt.u32.totalorder %s1489_s23, %s1832_s2 }
  0x27   :  { %p1495_p4 = pnand %p1493_p3, %p1490_p2 }
  0x29   :  { %1498 = shalt.err (!%p1495_p4)
}
  0x2a   :  { %s1499_s28 = scalar_lea.vmem %s44_s19, 2048  ;;  %p1504_p6 = scmp.lt.s32.totalorder %s44_s19, %s44_s19 }
  0x2b   :  { %p1500_p5 = scmp.ne.s32.totalorder %s44_s19, %s1499_s28  ;;  %p1505_p7 = scmp.lt.s32.totalorder %s1499_s28, %s1499_s28 }
  0x2d   :  { %p1506_p8 = por %p1505_p7, %p1504_p6 }
  0x2f   :  { %p1507_p9 = pnand %p1506_p8, %p1500_p5 }
  0x31   :  { %1510 = shalt.err (!%p1507_p9)
}
  0x32   :  { %49 = dma.hbm_to_vmem [thread:$0]  %s1832_s2, 2048, %s44_s19, [#allocation7], %s1541_s30, %s1541_s30, %s1542_s6  }
  0x33   :  { %1533 = dma.done.wait [#allocation4], 512  }
  0x34   :  { %1534 = vsyncadd [#allocation4], 4294966784 }
  0x35   :  { %1535 = dma.done.wait [#allocation7], 14336  }
  0x36   :  { %1536 = vsyncadd [#allocation7], 4294952960  ;;  %v178_v0 = vld [vmem:[#allocation6 + $0x80] sm:$0xff]  ;;  %v179_v1 = vld [vmem:[#allocation6 + $0x88] sm:$0xff]  ;;  %v85_v37 = vlaneseq  ;;  %vm1546_vm6 = vmmov 0   ;;  %vm428_vm7 = vcmask 1040384  }
  0x37   :  { %v162_v2 = vld [vmem:[#allocation6] sm:$0xff]  ;;  %v1256_v3 = vpack.c.bf16 %v179_v1, %v178_v0  ;;  %v163_v4 = vld [vmem:[#allocation6 + $0x8] sm:$0xff]  ;;  %v180_v9 = vld [vmem:[#allocation6 + $0x90] sm:$0xff] }
  0x38   :  { %v194_v5 = vld [vmem:[#allocation6 + $0x100] sm:$0xff]  ;;  %v195_v6 = vld [vmem:[#allocation6 + $0x108] sm:$0xff]  ;;  %v1258_v7 = vpack.c.bf16 %v163_v4, %v162_v2  ;;  %v181_v10 = vld [vmem:[#allocation6 + $0x98] sm:$0xff]  ;;  %v1630_v47 = vshrl.u32 %v85_v37, 7 }
  0x39   :  { %v1288_v8 = vpack.c.bf16 %v195_v6, %v194_v5  ;;  %v164_v11 = vld [vmem:[#allocation6 + $0x10] sm:$0xff]  ;;  %1257 = vmatprep.subr.bf16.mxu0 %v1256_v3  ;;  %v1260_v12 = vpack.c.bf16 %v181_v10, %v180_v9  ;;  %v165_v13 = vld [vmem:[#allocation6 + $0x18] sm:$0xff]  ;;  %v182_v18 = vld [vmem:[#allocation6 + $0xa0] sm:$0xff] }
  0x3a   :  { %v196_v14 = vld [vmem:[#allocation6 + $0x110] sm:$0xff]  ;;  %v197_v15 = vld [vmem:[#allocation6 + $0x118] sm:$0xff]  ;;  %1259 = vmatpush3.bf16.msra.mxu0 %v1258_v7  ;;  %v1262_v16 = vpack.c.bf16 %v165_v13, %v164_v11  ;;  %v183_v19 = vld [vmem:[#allocation6 + $0xa8] sm:$0xff]  ;;  %vm227_vm0 = vcmp.lt.s32.totalorder %v1630_v47, 7  ;;  %v87_v61 = vadd.s32 8, %v1630_v47  ;;  %v94_v6 = vand.u32 15, %v1630_v47 }
  0x3b   :  { %1289 = vmatprep.subr.bf16.mxu1 %v1288_v8  ;;  %v1292_v17 = vpack.c.bf16 %v197_v15, %v196_v14  ;;  %v166_v20 = vld [vmem:[#allocation6 + $0x20] sm:$0xff]  ;;  %1261 = vmatprep.subr.bf16.mxu0 %v1260_v12  ;;  %v1264_v21 = vpack.c.bf16 %v183_v19, %v182_v18  ;;  %v167_v22 = vld [vmem:[#allocation6 + $0x28] sm:$0xff]  ;;  %v184_v26 = vld [vmem:[#allocation6 + $0xb0] sm:$0xff]  ;;  %v89_v12 = vadd.s32 24, %v1630_v47  ;;  %vm214_vm1 = vcmp.lt.s32.totalorder %v1630_v47, 1 }
  0x3c   :  { %1291 = vmatpush3.bf16.msra.mxu1 %v1288_v8  ;;  %v198_v23 = vld [vmem:[#allocation6 + $0x120] sm:$0xff]  ;;  %v199_v24 = vld [vmem:[#allocation6 + $0x128] sm:$0xff]  ;;  %v185_v27 = vld [vmem:[#allocation6 + $0xb8] sm:$0xff]  ;;  %v1266_v30 = vpack.c.bf16 %v167_v22, %v166_v20  ;;  %v101_v11 = vand.u32 15, %v87_v61  ;;  %vm138_vm2 = vcmp.ne.s32.totalorder %v94_v6, 0  ;;  %v88_v22 = vadd.s32 16, %v1630_v47 }
  0x3d   :  { %1293 = vmatprep.subr.bf16.mxu1 %v1292_v17  ;;  %v1296_v25 = vpack.c.bf16 %v199_v24, %v198_v23  ;;  %v200_v28 = vld [vmem:[#allocation6 + $0x130] sm:$0xff]  ;;  %v201_v29 = vld [vmem:[#allocation6 + $0x138] sm:$0xff]  ;;  %v1268_v31 = vpack.c.bf16 %v185_v27, %v184_v26  ;;  %v186_v35 = vld [vmem:[#allocation6 + $0xc0] sm:$0xff]  ;;  %v115_v24 = vand.u32 15, %v89_v12  ;;  %v1544_v26 = vmov 0.0  }
  0x3e   :  { %1263 = vmatpush3.bf16.msra.mxu0 %v1262_v16  ;;  %v168_v32 = vld [vmem:[#allocation6 + $0x30] sm:$0xff]  ;;  %v169_v33 = vld [vmem:[#allocation6 + $0x38] sm:$0xff]  ;;  %v1300_v34 = vpack.c.bf16 %v201_v29, %v200_v28  ;;  %v187_v36 = vld [vmem:[#allocation6 + $0xc8] sm:$0xff]  ;;  %vm151_vm3 = vcmp.ne.s32.totalorder %v101_v11, 15  ;;  %v1657_v27 = vsel %vm138_vm2, 1.0, %v1544_v26 }
  0x3f   :  { %1265 = vmatprep.subr.bf16.mxu0 %v1264_v21  ;;  %v202_v38 = vld [vmem:[#allocation6 + $0x140] sm:$0xff]  ;;  %v203_v39 = vld [vmem:[#allocation6 + $0x148] sm:$0xff]  ;;  %v1270_v40 = vpack.c.bf16 %v169_v33, %v168_v32  ;;  %v1272_v41 = vpack.c.bf16 %v187_v36, %v186_v35  ;;  %v188_v45 = vld [vmem:[#allocation6 + $0xd0] sm:$0xff]  ;;  %v1662_v29 = vsel %vm151_vm3, 1.0, %v1544_v26  ;;  %vm153_vm4 = vcmp.ne.s32.totalorder %v115_v24, 15 }
  0x40   :  { %1295 = vmatpush3.bf16.msra.mxu1 %v1292_v17  ;;  %v170_v42 = vld [vmem:[#allocation6 + $0x40] sm:$0xff]  ;;  %v171_v43 = vld [vmem:[#allocation6 + $0x48] sm:$0xff]  ;;  %v1304_v44 = vpack.c.bf16 %v203_v39, %v202_v38  ;;  %v189_v46 = vld [vmem:[#allocation6 + $0xd8] sm:$0xff]  ;;  %v1672_v37 = vsel %vm153_vm4, 1.0, %v1544_v26 }
  0x41   :  { %1297 = vmatprep.subr.bf16.mxu1 %v1296_v25  ;;  %v204_v48 = vld [vmem:[#allocation6 + $0x150] sm:$0xff]  ;;  %v205_v49 = vld [vmem:[#allocation6 + $0x158] sm:$0xff]  ;;  %v1274_v50 = vpack.c.bf16 %v171_v43, %v170_v42  ;;  %v1632_v51 = vld [vmem:[#allocation3] sm:$0xff]  ;;  %v1276_v53 = vpack.c.bf16 %v189_v46, %v188_v45 }
  0x42   :  { %1267 = vmatpush3.bf16.msra.mxu0 %v1266_v30  ;;  %v1634_v52 = vld [vmem:[#allocation3 + $0x8] sm:$0xff]  ;;  %v172_v54 = vld [vmem:[#allocation6 + $0x50] sm:$0xff]  ;;  %v173_v55 = vld [vmem:[#allocation6 + $0x58] sm:$0xff]  ;;  %v223_v56 = vrot.slane %v1632_v51, 1  ;;  %v1308_v58 = vpack.c.bf16 %v205_v49, %v204_v48  ;;  %300 = vmatprep.mubr.f32.mxu0 %v1632_v51  ;;  %v210_v16 = vrot.slane %v1632_v51, 7 }
  0x43   :  { %1269 = vmatprep.subr.bf16.mxu0 %v1268_v31  ;;  %v224_v57 = vrot.slane %v1634_v52, 1  ;;  %v190_v59 = vld [vmem:[#allocation6 + $0xe0] sm:$0xff]  ;;  %v191_v60 = vld [vmem:[#allocation6 + $0xe8] sm:$0xff]  ;;  %v1278_v1 = vpack.c.bf16 %v173_v55, %v172_v54  ;;  %v1645_v5 = vld [vmem:[#allocation3 + $0x18] sm:$0xff]  ;;  %v108_v31 = vand.u32 15, %v88_v22  ;;  %v211_v35 = vrot.slane %v1634_v52, 7 }
  0x44   :  { %1299 = vmatpush3.bf16.msra.mxu1 %v1296_v25  ;;  %v206_v62 = vld [vmem:[#allocation6 + $0x160] sm:$0xff]  ;;  %v207_v63 = vld [vmem:[#allocation6 + $0x168] sm:$0xff]  ;;  %v1280_v2 = vpack.c.bf16 %v191_v60, %v190_v59  ;;  %v192_v8 = vld [vmem:[#allocation6 + $0xf0] sm:$0xff]  ;;  %v213_v17 = vrot.slane %v1645_v5, 7  ;;  %v226_v32 = vrot.slane %v1645_v5, 1 }
  0x45   :  { %1301 = vmatprep.subr.bf16.mxu1 %v1300_v34  ;;  %v230_v0 = vsel %vm227_vm0, %v223_v56, %v224_v57  ;;  %v174_v3 = vld [vmem:[#allocation6 + $0x60] sm:$0xff]  ;;  %v175_v4 = vld [vmem:[#allocation6 + $0x68] sm:$0xff]  ;;  %v1312_v7 = vpack.c.bf16 %v207_v63, %v206_v62  ;;  %v193_v9 = vld [vmem:[#allocation6 + $0xf8] sm:$0xff]  ;;  %vm140_vm5 = vcmp.ne.s32.totalorder %v108_v31, 0 }
  0x46   :  { %1271 = vmatpush3.bf16.msra.mxu0 %v1270_v40  ;;  %1142 = vmatprep.mubr.f32.mxu1 %v230_v0  ;;  %v1648_v10 = vld [vmem:[#allocation3 + $0x10] sm:$0xff]  ;;  %v209_v14 = vld [vmem:[#allocation6 + $0x178] sm:$0xff]  ;;  %v1282_v15 = vpack.c.bf16 %v175_v4, %v174_v3  ;;  %v1284_v18 = vpack.c.bf16 %v193_v9, %v192_v8  ;;  %v218_v28 = vsel %vm214_vm1, %v213_v17, %v210_v16  ;;  %v67_v46 = vld [vmem:[#allocation8] sm:$0xff] }
  0x47   :  { %1273 = vmatprep.subr.bf16.mxu0 %v1272_v41  ;;  %v208_v13 = vld [vmem:[#allocation6 + $0x170] sm:$0xff]  ;;  %v177_v20 = vld [vmem:[#allocation6 + $0x78] sm:$0xff]  ;;  %v225_v21 = vrot.slane %v1648_v10, 1  ;;  %v219_v33 = vmul.f32 %v1657_v27, %v218_v28  ;;  %v212_v36 = vrot.slane %v1648_v10, 7  ;;  %v231_v38 = vsel %vm227_vm0, %v226_v32, %v223_v56  ;;  %v68_v48 = vld [vmem:[#allocation8 + $0x8] sm:$0xff] }
  0x48   :  { %1303 = vmatpush3.bf16.msra.mxu1 %v1300_v34  ;;  %v176_v19 = vld [vmem:[#allocation6 + $0x70] sm:$0xff]  ;;  %v1316_v23 = vpack.c.bf16 %v209_v14, %v208_v13  ;;  %v217_v40 = vsel %vm214_vm1, %v210_v16, %v211_v35  ;;  %v1684_v41 = vsel %vm140_vm5, 1.0, %v1544_v26  ;;  %v235_v43 = vmul.f32 %v1672_v37, %v231_v38  ;;  %v70_v54 = vld [vmem:[#allocation8 + $0x18] sm:$0xff]  ;;  %v71_v56 = vld [vmem:[#allocation8 + $0x20] sm:$0xff] }
  0x49   :  { %1305 = vmatprep.subr.bf16.mxu1 %v1304_v44  ;;  %v1286_v25 = vpack.c.bf16 %v177_v20, %v176_v19  ;;  %v229_v30 = vsel %vm227_vm0, %v224_v57, %v225_v21  ;;  %v228_v39 = vsel %vm227_vm0, %v225_v21, %v226_v32  ;;  %v216_v42 = vsel %vm214_vm1, %v211_v35, %v212_v36  ;;  %v72_v57 = vld [vmem:[#allocation8 + $0x28] sm:$0xff]  ;;  %v73_v59 = vld [vmem:[#allocation8 + $0x30] sm:$0xff]  ;;  %v74_v60 = vld [vmem:[#allocation8 + $0x38] sm:$0xff] }
  0x4a   :  { %1275 = vmatpush3.bf16.msra.mxu0 %v1274_v50  ;;  %v233_v34 = vmul.f32 %v1662_v29, %v229_v30  ;;  %v215_v45 = vsel %vm214_vm1, %v212_v36, %v213_v17  ;;  %v1694_v49 = vpack.c.bf16 %v68_v48, %v67_v46  ;;  %v1545_v50 = vmov 0.0|0.0   ;;  %v75_v62 = vld [vmem:[#allocation8 + $0x40] sm:$0xff]  ;;  %v76_v63 = vld [vmem:[#allocation8 + $0x48] sm:$0xff]  ;;  %v81_v8 = vld [vmem:[#allocation8 + $0x70] sm:$0xff] }
  0x4b   :  { %1277 = vmatprep.subr.bf16.mxu0 %v1276_v53  ;;  %v69_v53 = vld [vmem:[#allocation8 + $0x10] sm:$0xff]  ;;  %v1707_v61 = vpack.c.bf16 %v74_v60, %v73_v59  ;;  %v1711_v0 = vpack.c.bf16 %v76_v63, %v75_v62  ;;  %v79_v4 = vld [vmem:[#allocation8 + $0x60] sm:$0xff]  ;;  %v80_v6 = vld [vmem:[#allocation8 + $0x68] sm:$0xff] }
  0x4c   :  { %1307 = vmatpush3.bf16.msra.mxu1 %v1304_v44  ;;  %v221_v44 = vmul.f32 %v1684_v41, %v216_v42  ;;  %v1699_v55 = vpack.c.bf16 %v70_v54, %v69_v53  ;;  %v82_v9 = vld [vmem:[#allocation8 + $0x78] sm:$0xff] }
  0x4d   :  { %1309 = vmatprep.subr.bf16.mxu1 %v1308_v58  ;;  %v1724_v11 = vpack.c.bf16 %v82_v9, %v81_v8  ;;  %v565_v8 = vld [vmem:[#allocation6 + $0x200] sm:$0xff]  ;;  %v566_v9 = vld [vmem:[#allocation6 + $0x208] sm:$0xff] }
  0x4e   :  { %1279 = vmatpush3.bf16.msra.mxu0 %v1278_v1  ;;  %v77_v1 = vld [vmem:[#allocation8 + $0x50] sm:$0xff] }
  0x4f   :  { %1281 = vmatprep.subr.bf16.mxu0 %v1280_v2  ;;  %v78_v2 = vld [vmem:[#allocation8 + $0x58] sm:$0xff] }
  0x50   :  { %1311 = vmatpush3.bf16.msra.mxu1 %v1308_v58  ;;  %v1703_v58 = vpack.c.bf16 %v72_v57, %v71_v56  ;;  %v1715_v3 = vpack.c.bf16 %v78_v2, %v77_v1 }
  0x51   :  { %1313 = vmatprep.subr.bf16.mxu1 %v1312_v7 }
  0x52   :  { %1283 = vmatpush3.bf16.msra.mxu0 %v1282_v15 }
  0x53   :  { %1285 = vmatprep.subr.bf16.mxu0 %v1284_v18 }
  0x54   :  { %1315 = vmatpush3.bf16.msra.mxu1 %v1312_v7  ;;  %v1719_v7 = vpack.c.bf16 %v80_v6, %v79_v4 }
  0x55   :  { %1317 = vmatprep.subr.bf16.mxu1 %v1316_v23 }
  0x56   :  { %1287 = vmatpush3.bf16.msra.mxu0 %v1286_v25 }
  0x57   :  { %1320 = vmatprep.subr.bf16.mxu0 %v1545_v50 }
  0x58   :  { %1319 = vmatpush3.bf16.msra.mxu1 %v1316_v23 }
  0x59   :  { %301 = vmatmul.mubr.f32.vlgmr.msra.gmra.mrb[0].mxu0 %v219_v33 }
  0x5a   :  { %305 = vmatprep.mubr.f32.mxu0 %v1634_v52  ;;  %1322 = vmatpush3.bf16.msra.mxu0 %v1694_v49 }
  0x5b   :  { %1143 = vmatmul.mubr.f32.vlgmr.msra.gmra.mrb[0].mxu1 %v233_v34  ;;  %1323 = vmatprep.subr.bf16.mxu0 %v1545_v50 }
  0x5c   :  { %1145 = vmatprep.mubr.f32.mxu1 %v228_v39 }
  0x5d   :  { %306 = vmatmul.mubr.f32.gmra.mrb[2].mxu0 %v217_v40 }
  0x5e   :  { %310 = vmatprep.mubr.f32.mxu0 %v1648_v10  ;;  %1325 = vmatpush3.bf16.msra.mxu0 %v1699_v55 }
  0x5f   :  { %1146 = vmatmul.mubr.f32.gmra.mrb[2].mxu1 %v235_v43  ;;  %1326 = vmatprep.subr.bf16.mxu0 %v1545_v50 }
  0x61   :  { %311 = vmatmul.mubr.f32.gmra.mrb[4].mxu0 %v221_v44 }
  0x62   :  { %315 = vmatprep.mubr.f32.mxu0 %v1645_v5  ;;  %1328 = vmatpush3.bf16.msra.mxu0 %v1703_v58 }
  0x63   :  { %1329 = vmatprep.subr.bf16.mxu0 %v1545_v50 }
  0x65   :  { %316 = vmatmul.mubr.f32.gmra.mrb[6].mxu0 %v215_v45 }
  0x66   :  { %1331 = vmatpush3.bf16.msra.mxu0 %v1707_v61  ;;  %1180 = vmatprep.mubr.msk.f32.mxu0 %vm1546_vm6, %v1544_v26 }
  0x67   :  { %1332 = vmatprep.subr.bf16.mxu0 %v1545_v50 }
  0x6a   :  { %1334 = vmatpush3.bf16.msra.mxu0 %v1711_v0 }
  0x6b   :  { %1335 = vmatprep.subr.bf16.mxu0 %v1545_v50 }
  0x6e   :  { %1337 = vmatpush3.bf16.msra.mxu0 %v1715_v3 }
  0x6f   :  { %1338 = vmatprep.subr.bf16.mxu0 %v1545_v50 }
  0x72   :  { %1340 = vmatpush3.bf16.msra.mxu0 %v1719_v7 }
  0x73   :  { %1341 = vmatprep.subr.bf16.mxu0 %v1545_v50 }
  0x76   :  { %1343 = vmatpush3.bf16.msra.mxu0 %v1724_v11 }
 0x12c   :  { %v980_v12 = vpop.f32.mrb[0].mxu0 }
 0x12d   :  { %v981_v13 = vpop.f32.mrb[1].mxu0 }
 0x12e   :  { %v1144_v14 = vpop.f32.mrb[0].mxu1  ;;  %v982_v15 = vadd.f32 %v981_v13, %v980_v12  ;;  %v581_v12 = vld [vmem:[#allocation6 + $0x280] sm:$0xff]  ;;  %v1344_v13 = vpack.c.bf16 %v566_v9, %v565_v8  ;;  %v558_v9 = vld [vmem:[#allocation6 + $0x1c8] sm:$0xff] }
 0x12f   :  { %v387_v16 = vpop.f32.mrb[1].mxu1  ;;  %v557_v8 = vld [vmem:[#allocation6 + $0x1c0] sm:$0xff] }
 0x130   :  { %v1728_v17 = vadd.f32 %v982_v15, %v387_v16  ;;  %v983_v18 = vpop.f32.mrb[2].mxu0  ;;  %v549_v15 = vld [vmem:[#allocation6 + $0x180] sm:$0xff]  ;;  %v550_v16 = vld [vmem:[#allocation6 + $0x188] sm:$0xff]  ;;  %1345 = vmatprep.subr.bf16.mxu1 %v1344_v13  ;;  %v1362_v13 = vpack.c.bf16 %v558_v9, %v557_v8  ;;  %v1757_v8 = vsub.s32 1, %v1630_v47 }
 0x131   :  { %v984_v19 = vpop.f32.mrb[3].mxu0 }
 0x132   :  { %v1147_v20 = vpop.f32.mrb[2].mxu1  ;;  %v985_v21 = vadd.f32 %v984_v19, %v983_v18  ;;  %v415_v34 = vmul.f32 %v1728_v17, %v1728_v17  ;;  %v1346_v19 = vpack.c.bf16 %v550_v16, %v549_v15  ;;  %v576_v15 = vld [vmem:[#allocation6 + $0x258] sm:$0xff]  ;;  %v591_v16 = vld [vmem:[#allocation6 + $0x2d0] sm:$0xff] }
 0x133   :  { %v397_v22 = vpop.f32.mrb[3].mxu1 }
 0x134   :  { %v1730_v23 = vadd.f32 %v1144_v14, %v985_v21  ;;  %v986_v24 = vpop.f32.mrb[4].mxu0  ;;  %v582_v14 = vld [vmem:[#allocation6 + $0x288] sm:$0xff]  ;;  %1347 = vmatpush3.bf16.msra.mxu1 %v1346_v19  ;;  %v568_v21 = vld [vmem:[#allocation6 + $0x218] sm:$0xff] }
 0x135   :  { %v987_v25 = vpop.f32.mrb[5].mxu0  ;;  %v1376_v18 = vpack.c.bf16 %v582_v14, %v581_v12  ;;  %v575_v14 = vld [vmem:[#allocation6 + $0x250] sm:$0xff]  ;;  %v592_v19 = vld [vmem:[#allocation6 + $0x2d8] sm:$0xff] }
 0x136   :  { %v988_v28 = vadd.f32 %v987_v25, %v986_v24  ;;  %v416_v30 = vmul.f32 %v1730_v23, %v1730_v23  ;;  %v406_v35 = vadd.f32 %v1730_v23, %v1728_v17  ;;  %v584_v25 = vld [vmem:[#allocation6 + $0x298] sm:$0xff] }
 0x137   :  { %1377 = vmatprep.subr.bf16.mxu0 %v1376_v18 }
 0x138   :  { %v1734_v31 = vadd.f32 %v988_v28, %v397_v22  ;;  %v989_v32 = vpop.f32.mrb[6].mxu0  ;;  %v419_v40 = vadd.f32 %v416_v30, %v415_v34  ;;  %v583_v22 = vld [vmem:[#allocation6 + $0x290] sm:$0xff]  ;;  %v552_v30 = vld [vmem:[#allocation6 + $0x198] sm:$0xff]  ;;  %v569_v34 = vld [vmem:[#allocation6 + $0x220] sm:$0xff] }
 0x139   :  { %v990_v33 = vpop.f32.mrb[7].mxu0  ;;  %v551_v28 = vld [vmem:[#allocation6 + $0x190] sm:$0xff] }
 0x13a   :  { %v417_v36 = vmul.f32 %v1734_v31, %v1734_v31  ;;  %v991_v38 = vadd.f32 %v990_v33, %v989_v32  ;;  %v407_v39 = vadd.f32 %v406_v35, %v1734_v31  ;;  %v1380_v32 = vpack.c.bf16 %v584_v25, %v583_v22  ;;  %v570_v35 = vld [vmem:[#allocation6 + $0x228] sm:$0xff]  ;;  %v577_v25 = vld [vmem:[#allocation6 + $0x260] sm:$0xff] }
 0x13b   :  { %v1350_v33 = vpack.c.bf16 %v552_v30, %v551_v28  ;;  %v1396_v22 = vpack.c.bf16 %v592_v19, %v591_v16  ;;  %v578_v28 = vld [vmem:[#allocation6 + $0x268] sm:$0xff]  ;;  %v593_v30 = vld [vmem:[#allocation6 + $0x2e0] sm:$0xff] }
 0x13c   :  { %v1743_v42 = vadd.f32 %v1147_v20, %v991_v38  ;;  %v420_v43 = vadd.f32 %v419_v40, %v417_v36  ;;  %v567_v20 = vld [vmem:[#allocation6 + $0x210] sm:$0xff]  ;;  %v585_v36 = vld [vmem:[#allocation6 + $0x2a0] sm:$0xff]  ;;  %v1352_v38 = vpack.c.bf16 %v570_v35, %v569_v34  ;;  %v562_v35 = vld [vmem:[#allocation6 + $0x1e8] sm:$0xff] }
 0x13d   :  { %v1348_v24 = vpack.c.bf16 %v568_v21, %v567_v20  ;;  %v553_v40 = vld [vmem:[#allocation6 + $0x1a0] sm:$0xff]  ;;  %v559_v20 = vld [vmem:[#allocation6 + $0x1d0] sm:$0xff]  ;;  %v560_v21 = vld [vmem:[#allocation6 + $0x1d8] sm:$0xff] }
 0x13e   :  { %v408_v44 = vadd.f32 %v407_v39, %v1743_v42  ;;  %v418_v45 = vmul.f32 %v1743_v42, %v1743_v42  ;;  %v586_v39 = vld [vmem:[#allocation6 + $0x2a8] sm:$0xff]  ;;  %v561_v34 = vld [vmem:[#allocation6 + $0x1e0] sm:$0xff] }
 0x13f   :  { %1349 = vmatprep.subr.bf16.mxu1 %v1348_v24  ;;  %v1366_v24 = vpack.c.bf16 %v560_v21, %v559_v20 }
 0x140   :  { %v409_v46 = vrot.slane %v408_v44, 4  ;;  %v421_v48 = vadd.f32 %v420_v43, %v418_v45  ;;  %1351 = vmatpush3.bf16.msra.mxu1 %v1350_v33  ;;  %v554_v43 = vld [vmem:[#allocation6 + $0x1a8] sm:$0xff] }
 0x141   :  { %v1354_v45 = vpack.c.bf16 %v554_v43, %v553_v40  ;;  %1353 = vmatprep.subr.bf16.mxu1 %v1352_v38  ;;  %v594_v33 = vld [vmem:[#allocation6 + $0x2e8] sm:$0xff]  ;;  %v1370_v38 = vpack.c.bf16 %v562_v35, %v561_v34  ;;  %v580_v40 = vld [vmem:[#allocation6 + $0x278] sm:$0xff]  ;;  %v595_v43 = vld [vmem:[#allocation6 + $0x2f0] sm:$0xff] }
 0x142   :  { %v410_v53 = vadd.f32 %v409_v46, %v408_v44  ;;  %v422_v54 = vrot.slane %v421_v48, 4  ;;  %v1384_v44 = vpack.c.bf16 %v586_v39, %v585_v36  ;;  %v571_v46 = vld [vmem:[#allocation6 + $0x230] sm:$0xff]  ;;  %v1400_v36 = vpack.c.bf16 %v594_v33, %v593_v30 }
 0x143   :  { %v579_v39 = vld [vmem:[#allocation6 + $0x270] sm:$0xff] }
 0x144   :  { %v411_v56 = vrot.slane %v410_v53, 2  ;;  %v423_v57 = vadd.f32 %v422_v54, %v421_v48  ;;  %1355 = vmatpush3.bf16.msra.mxu1 %v1354_v45  ;;  %v572_v48 = vld [vmem:[#allocation6 + $0x238] sm:$0xff] }
 0x145   :  { %v1356_v54 = vpack.c.bf16 %v572_v48, %v571_v46  ;;  %v596_v45 = vld [vmem:[#allocation6 + $0x2f8] sm:$0xff]  ;;  %v563_v46 = vld [vmem:[#allocation6 + $0x1f0] sm:$0xff] }
 0x146   :  { %v412_v59 = vadd.f32 %v411_v56, %v410_v53  ;;  %v424_v60 = vrot.slane %v423_v57, 2  ;;  %v587_v53 = vld [vmem:[#allocation6 + $0x2b0] sm:$0xff]  ;;  %v588_v56 = vld [vmem:[#allocation6 + $0x2b8] sm:$0xff] }
 0x147   :  { %1357 = vmatprep.subr.bf16.mxu1 %v1356_v54  ;;  %v564_v48 = vld [vmem:[#allocation6 + $0x1f8] sm:$0xff] }
 0x148   :  { %v413_v62 = vrot.slane %v412_v59, 1  ;;  %v425_v63 = vadd.f32 %v424_v60, %v423_v57  ;;  %v555_v57 = vld [vmem:[#allocation6 + $0x1b0] sm:$0xff]  ;;  %v1388_v60 = vpack.c.bf16 %v588_v56, %v587_v53  ;;  %v1404_v53 = vpack.c.bf16 %v596_v45, %v595_v43 }
 0x149   :  { %v1374_v54 = vpack.c.bf16 %v564_v48, %v563_v46 }
 0x14a   :  { %v426_v1 = vrot.slane %v425_v63, 1  ;;  %v414_v2 = vadd.f32 %v413_v62, %v412_v59  ;;  %v556_v59 = vld [vmem:[#allocation6 + $0x1b8] sm:$0xff] }
 0x14b   :  { %v1358_v62 = vpack.c.bf16 %v556_v59, %v555_v57 }
 0x14c   :  { %v427_v4 = vadd.f32 %v426_v1, %v425_v63  ;;  %v573_v63 = vld [vmem:[#allocation6 + $0x240] sm:$0xff]  ;;  %v574_v1 = vld [vmem:[#allocation6 + $0x248] sm:$0xff] }
 0x14d   :  { %1359 = vmatpush3.bf16.msra.mxu1 %v1358_v62 }
 0x14e   :  { %v429_v6 = vsel %vm428_vm7, %v414_v2, %v427_v4  ;;  %v589_v2 = vld [vmem:[#allocation6 + $0x2c0] sm:$0xff]  ;;  %v1360_v4 = vpack.c.bf16 %v574_v1, %v573_v63 }
 0x14f   :  { %1181 = vmatmul.mubr.f32.vlgmr.msra.gmra.mrb[8].mxu0 %v429_v6  ;;  %v590_v6 = vld [vmem:[#allocation6 + $0x2c8] sm:$0xff]  ;;  %v1753_v1 = vld [vmem:[%s1833_s3] sm:$0xf] }
 0x150   :  { %1379 = vmatpush3.bf16.msra.mxu0 %v1376_v18  ;;  %v1392_v12 = vpack.c.bf16 %v590_v6, %v589_v2  ;;  %1361 = vmatprep.subr.bf16.mxu1 %v1360_v4  ;;  %v1364_v18 = vpack.c.bf16 %v576_v15, %v575_v14  ;;  %v508_v2 = vrot.slane %v1753_v1, 7 }
 0x151   :  { %1381 = vmatprep.subr.bf16.mxu0 %v1380_v32  ;;  %1363 = vmatpush3.bf16.msra.mxu1 %v1362_v13 }
 0x152   :  { %1365 = vmatprep.subr.bf16.mxu1 %v1364_v18 }
 0x154   :  { %1383 = vmatpush3.bf16.msra.mxu0 %v1380_v32  ;;  %v1368_v32 = vpack.c.bf16 %v578_v28, %v577_v25 }
 0x155   :  { %1385 = vmatprep.subr.bf16.mxu0 %v1384_v44  ;;  %1367 = vmatpush3.bf16.msra.mxu1 %v1366_v24 }
 0x156   :  { %1369 = vmatprep.subr.bf16.mxu1 %v1368_v32 }
 0x158   :  { %1387 = vmatpush3.bf16.msra.mxu0 %v1384_v44  ;;  %v1372_v44 = vpack.c.bf16 %v580_v40, %v579_v39 }
 0x159   :  { %1389 = vmatprep.subr.bf16.mxu0 %v1388_v60  ;;  %1371 = vmatpush3.bf16.msra.mxu1 %v1370_v38 }
 0x15a   :  { %1373 = vmatprep.subr.bf16.mxu1 %v1372_v44 }
 0x15c   :  { %1391 = vmatpush3.bf16.msra.mxu0 %v1388_v60 }
 0x15d   :  { %1393 = vmatprep.subr.bf16.mxu0 %v1392_v12  ;;  %1375 = vmatpush3.bf16.msra.mxu1 %v1374_v54 }
 0x15e   :  { %1408 = vmatprep.subr.bf16.mxu1 %v1545_v50 }
 0x160   :  { %1395 = vmatpush3.bf16.msra.mxu0 %v1392_v12 }
 0x161   :  { %1397 = vmatprep.subr.bf16.mxu0 %v1396_v22 }
 0x164   :  { %1399 = vmatpush3.bf16.msra.mxu0 %v1396_v22  ;;  %v539_v22 = vstv %s1834_s4  ;;  %s1547_s4 = smov [#allocation9]  }
 0x165   :  { %1401 = vmatprep.subr.bf16.mxu0 %v1400_v36  ;;  %s931_s8 = sshll.u32 %s1547_s4, 4  ;;  %s932_s8 = int_to_ptr.vmem [resolvable:$true] %s931_s8 }
 0x166   :  { %s1511_s9 = scalar_lea.vmem %s932_s8, 512  ;;  %p1516_p11 = scmp.lt.s32.totalorder %s932_s8, %s932_s8 }
 0x167   :  { %p1512_p10 = scmp.ne.s32.totalorder %s932_s8, %s1511_s9  ;;  %p1517_p12 = scmp.lt.s32.totalorder %s1511_s9, %s1511_s9 }
 0x168   :  { %1403 = vmatpush3.bf16.msra.mxu0 %v1400_v36 }
 0x169   :  { %1405 = vmatprep.subr.bf16.mxu0 %v1404_v53  ;;  %p1518_p13 = por %p1517_p12, %p1516_p11 }
 0x16b   :  { %p1519_p0 = pnand %p1518_p13, %p1512_p10 }
 0x16c   :  { %1407 = vmatpush3.bf16.msra.mxu0 %v1404_v53 }
 0x222   :  { %v496_v56 = vpop.f32.mrb[8].mxu0 }
 0x223   :  { %v500_v57 = vmul.f32 %v496_v56, %v496_v56  ;;  %v1182_v59 = vpop.f32.mrb[9].mxu0 }
 0x225   :  { %v502_v60 = vrot.slane %v500_v57, 7 }
 0x227   :  { %v504_v62 = vsub.f32 %v496_v56, %v502_v60 }
 0x229   :  { %v505_v63 = vadd.f32 1e-05, %v504_v62 }
 0x22b   :  { %1441 = vrsqrt.f32 %v505_v63 }
 0x235   :  { %v1442_v4 = vpop.eup %1441 }
 0x236   :  { %v510_v6 = vmul.f32 %v1442_v4, %v508_v2 }
 0x238   :  { %v512_v9 = vrot.slane %v510_v6, 1  ;;  %v522_v13 = vrot.slane %v510_v6, %v1757_v8 }
 0x23a   :  { %v514_v12 = vmul.f32 %v512_v9, %v496_v56  ;;  %v525_v16 = vmul.f32 %v522_v13, %v1734_v31  ;;  %v526_v18 = vmul.f32 %v522_v13, %v1743_v42  ;;  %v523_v20 = vmul.f32 %v522_v13, %v1728_v17 }
 0x23b   :  { %v524_v21 = vmul.f32 %v522_v13, %v1730_v23 }
 0x23c   :  { %v516_v14 = vrot.slane %v514_v12, 7 }
 0x23e   :  { %v518_v15 = vsub.f32 %v1753_v1, %v516_v14 }
 0x240   :  { %v530_v19 = vrot.slane %v518_v15, %v1757_v8 }
 0x242   :  { %v533_v24 = vadd.f32 %v530_v19, %v525_v16  ;;  %v534_v25 = vadd.f32 %v530_v19, %v526_v18  ;;  %v531_v28 = vadd.f32 %v530_v19, %v523_v20  ;;  %v532_v30 = vadd.f32 %v530_v19, %v524_v21 }
 0x244   :  { %vm535_vm8 = vcmp.gt.f32.partialorder %v531_v28, 0.0  ;;  %vm538_vm9 = vcmp.gt.f32.partialorder %v534_v25, 0.0  ;;  %v540_v32 = vmul.f32 %v539_v22, %v531_v28  ;;  %v542_v31 = vmul.f32 %v539_v22, %v533_v24 }
 0x245   :  { %v543_v33 = vmul.f32 %v539_v22, %v534_v25  ;;  %vm536_vm10 = vcmp.gt.f32.partialorder %v532_v30, 0.0  ;;  %v541_v42 = vmul.f32 %v539_v22, %v532_v30  ;;  %vm537_vm11 = vcmp.gt.f32.partialorder %v533_v24, 0.0 }
 0x246   :  { %v544_v34 = vsel %vm535_vm8, %v531_v28, %v540_v32  ;;  %v546_v17 = vsel %vm537_vm11, %v533_v24, %v542_v31 }
 0x247   :  { %v547_v35 = vsel %vm538_vm9, %v534_v25, %v543_v33  ;;  %v597_v23 = vrot.slane %v544_v34, 7  ;;  %v609_v36 = vrot.slane %v544_v34, 1  ;;  %685 = vmatprep.mubr.f32.mxu1 %v544_v34  ;;  %v545_v38 = vsel %vm536_vm10, %v532_v30, %v541_v42 }
 0x248   :  { %v600_v39 = vrot.slane %v547_v35, 7  ;;  %v610_v40 = vrot.slane %v545_v38, 1  ;;  %v611_v43 = vrot.slane %v546_v17, 1  ;;  %v612_v44 = vrot.slane %v547_v35, 1 }
 0x249   :  { %v598_v56 = vrot.slane %v545_v38, 7  ;;  %v599_v59 = vrot.slane %v546_v17, 7 }
 0x24a   :  { %v604_v45 = vsel %vm214_vm1, %v600_v39, %v597_v23  ;;  %v615_v46 = vsel %vm227_vm0, %v609_v36, %v610_v40  ;;  %v614_v48 = vsel %vm227_vm0, %v610_v40, %v611_v43  ;;  %v616_v57 = vsel %vm227_vm0, %v612_v44, %v609_v36 }
 0x24b   :  { %v605_v53 = vmul.f32 %v1657_v27, %v604_v45  ;;  %1215 = vmatprep.mubr.f32.mxu0 %v615_v46  ;;  %v618_v54 = vmul.f32 %v1662_v29, %v614_v48  ;;  %v613_v60 = vsel %vm227_vm0, %v611_v43, %v612_v44  ;;  %v620_v62 = vmul.f32 %v1672_v37, %v616_v57 }
 0x24c   :  { %v603_v27 = vsel %vm214_vm1, %v597_v23, %v598_v56  ;;  %v602_v29 = vsel %vm214_vm1, %v598_v56, %v599_v59  ;;  %v601_v37 = vsel %vm214_vm1, %v599_v59, %v600_v39  ;;  %v891_v57 = vrot.slane %v1753_v1, 1 }
 0x24d   :  { %686 = vmatmul.mubr.f32.vlgmr.msra.gmra.mrb[4].mxu1 %v605_v53  ;;  %1216 = vmatmul.mubr.f32.vlgmr.msra.gmra.mrb[10].mxu0 %v618_v54  ;;  %v607_v63 = vmul.f32 %v1684_v41, %v602_v29 }
 0x24e   :  { %690 = vmatprep.mubr.f32.mxu1 %v545_v38  ;;  %1218 = vmatprep.mubr.f32.mxu0 %v613_v60 }
 0x24f   :  { %1410 = vmatpush3.bf16.msra.mxu1 %v1694_v49 }
 0x250   :  { %1411 = vmatprep.subr.bf16.mxu1 %v1545_v50 }
 0x251   :  { %691 = vmatmul.mubr.f32.gmra.mrb[6].mxu1 %v603_v27  ;;  %1219 = vmatmul.mubr.f32.gmra.mrb[12].mxu0 %v620_v62 }
 0x252   :  { %695 = vmatprep.mubr.f32.mxu1 %v546_v17 }
 0x253   :  { %1413 = vmatpush3.bf16.msra.mxu1 %v1699_v55 }
 0x254   :  { %1414 = vmatprep.subr.bf16.mxu1 %v1545_v50 }
 0x255   :  { %696 = vmatmul.mubr.f32.gmra.mrb[8].mxu1 %v607_v63 }
 0x256   :  { %700 = vmatprep.mubr.f32.mxu1 %v547_v35 }
 0x257   :  { %1416 = vmatpush3.bf16.msra.mxu1 %v1703_v58 }
 0x258   :  { %1417 = vmatprep.subr.bf16.mxu1 %v1545_v50 }
 0x259   :  { %701 = vmatmul.mubr.f32.gmra.mrb[10].mxu1 %v601_v37  ;;  %v912_v37 = vsub.s32 3, %v1630_v47 }
 0x25a   :  { %1253 = vmatprep.mubr.msk.f32.mxu1 %vm1546_vm6, %v1544_v26 }
 0x25b   :  { %1419 = vmatpush3.bf16.msra.mxu1 %v1707_v61 }
 0x25c   :  { %1420 = vmatprep.subr.bf16.mxu1 %v1545_v50 }
 0x25f   :  { %1422 = vmatpush3.bf16.msra.mxu1 %v1711_v0 }
 0x260   :  { %1423 = vmatprep.subr.bf16.mxu1 %v1545_v50 }
 0x263   :  { %1425 = vmatpush3.bf16.msra.mxu1 %v1715_v3 }
 0x264   :  { %1426 = vmatprep.subr.bf16.mxu1 %v1545_v50 }
 0x267   :  { %1428 = vmatpush3.bf16.msra.mxu1 %v1719_v7 }
 0x268   :  { %1429 = vmatprep.subr.bf16.mxu1 %v1545_v50 }
 0x26b   :  { %1431 = vmatpush3.bf16.msra.mxu1 %v1724_v11 }
 0x320   :  { %v1061_v41 = vpop.f32.mrb[4].mxu1  ;;  %v1217_v26 = vpop.f32.mrb[10].mxu0 }
 0x321   :  { %v1062_v49 = vpop.f32.mrb[5].mxu1  ;;  %v772_v55 = vpop.f32.mrb[11].mxu0 }
 0x322   :  { %v1063_v58 = vadd.f32 %v1062_v49, %v1061_v41 }
 0x324   :  { %v773_v61 = vadd.f32 %v1063_v58, %v772_v55  ;;  %v1064_v2 = vpop.f32.mrb[6].mxu1  ;;  %v1220_v0 = vpop.f32.mrb[12].mxu0 }
 0x325   :  { %v1065_v4 = vpop.f32.mrb[7].mxu1  ;;  %v782_v6 = vpop.f32.mrb[13].mxu0 }
 0x326   :  { %v1066_v9 = vadd.f32 %v1065_v4, %v1064_v2  ;;  %v800_v11 = vmul.f32 %v773_v61, %v773_v61 }
 0x328   :  { %v778_v3 = vadd.f32 %v1217_v26, %v1066_v9  ;;  %v1067_v12 = vpop.f32.mrb[8].mxu1 }
 0x329   :  { %v1068_v13 = vpop.f32.mrb[9].mxu1 }
 0x32a   :  { %v1069_v14 = vadd.f32 %v1068_v13, %v1067_v12  ;;  %v801_v7 = vmul.f32 %v778_v3, %v778_v3  ;;  %v791_v18 = vadd.f32 %v778_v3, %v773_v61 }
 0x32c   :  { %v783_v15 = vadd.f32 %v1069_v14, %v782_v6  ;;  %v1070_v50 = vpop.f32.mrb[10].mxu1  ;;  %v804_v21 = vadd.f32 %v801_v7, %v800_v11 }
 0x32d   :  { %v1071_v16 = vpop.f32.mrb[11].mxu1 }
 0x32e   :  { %v802_v19 = vmul.f32 %v783_v15, %v783_v15  ;;  %v1072_v20 = vadd.f32 %v1071_v16, %v1070_v50  ;;  %v792_v22 = vadd.f32 %v791_v18, %v783_v15 }
 0x330   :  { %v788_v24 = vadd.f32 %v1220_v0, %v1072_v20  ;;  %v805_v25 = vadd.f32 %v804_v21, %v802_v19 }
 0x332   :  { %v793_v28 = vadd.f32 %v792_v22, %v788_v24  ;;  %v803_v30 = vmul.f32 %v788_v24, %v788_v24 }
 0x334   :  { %v794_v32 = vrot.slane %v793_v28, 4  ;;  %v806_v31 = vadd.f32 %v805_v25, %v803_v30 }
 0x336   :  { %v795_v33 = vadd.f32 %v794_v32, %v793_v28  ;;  %v807_v42 = vrot.slane %v806_v31, 4 }
 0x338   :  { %v796_v34 = vrot.slane %v795_v33, 2  ;;  %v808_v17 = vadd.f32 %v807_v42, %v806_v31 }
 0x33a   :  { %v797_v35 = vadd.f32 %v796_v34, %v795_v33  ;;  %v809_v23 = vrot.slane %v808_v17, 2 }
 0x33c   :  { %v798_v36 = vrot.slane %v797_v35, 1  ;;  %v810_v38 = vadd.f32 %v809_v23, %v808_v17 }
 0x33e   :  { %v811_v39 = vrot.slane %v810_v38, 1  ;;  %v799_v40 = vadd.f32 %v798_v36, %v797_v35 }
 0x340   :  { %v812_v43 = vadd.f32 %v811_v39, %v810_v38 }
 0x342   :  { %v813_v44 = vsel %vm428_vm7, %v799_v40, %v812_v43 }
 0x343   :  { %1254 = vmatmul.mubr.f32.vlgmr.msra.gmra.mrb[12].mxu1 %v813_v44 }
 0x416   :  { %v880_v45 = vpop.f32.mrb[12].mxu1 }
 0x417   :  { %v884_v46 = vmul.f32 %v880_v45, %v880_v45  ;;  %v1255_v48 = vpop.f32.mrb[13].mxu1 }
 0x419   :  { %v886_v53 = vrot.slane %v884_v46, 7 }
 0x41b   :  { %v888_v54 = vsub.f32 %v880_v45, %v886_v53 }
 0x41d   :  { %v889_v56 = vadd.f32 1e-05, %v888_v54 }
 0x41f   :  { %1443 = vrsqrt.f32 %v889_v56 }
 0x429   :  { %v1444_v59 = vpop.eup %1443 }
 0x42a   :  { %v893_v60 = vmul.f32 %v1444_v59, %v891_v57 }
 0x42c   :  { %v895_v62 = vrot.slane %v893_v60, 1  ;;  %v905_v29 = vrot.slane %v893_v60, %v1757_v8 }
 0x42e   :  { %v897_v27 = vmul.f32 %v895_v62, %v880_v45  ;;  %v906_v26 = vmul.f32 %v905_v29, %v773_v61  ;;  %v907_v55 = vmul.f32 %v905_v29, %v778_v3  ;;  %v908_v58 = vmul.f32 %v905_v29, %v783_v15 }
 0x42f   :  { %v909_v2 = vmul.f32 %v905_v29, %v788_v24 }
 0x430   :  { %v899_v63 = vrot.slane %v897_v27, 5 }
 0x432   :  { %v901_v41 = vsub.f32 %v1753_v1, %v899_v63 }
 0x434   :  { %v913_v49 = vrot.slane %v901_v41, %v912_v37 }
 0x436   :  { %v914_v0 = vadd.f32 %v913_v49, %v906_v26  ;;  %v915_v4 = vadd.f32 %v913_v49, %v907_v55  ;;  %v916_v6 = vadd.f32 %v913_v49, %v908_v58  ;;  %v917_v9 = vadd.f32 %v913_v49, %v909_v2 }
 0x438   :  { %v918_v12 = vadd.f32 %v914_v0, %v1632_v51  ;;  %v919_v8 = vadd.f32 %v915_v4, %v1634_v52  ;;  %v920_v13 = vadd.f32 %v916_v6, %v1648_v10  ;;  %v921_v47 = vadd.f32 %v917_v9, %v1645_v5 }
 0x43a   :  { %922 = vst [vmem:[#allocation9] sm:$0xff] %v918_v12  ;;  %923 = vst [vmem:[#allocation9 + $0x8] sm:$0xff] %v919_v8 }
 0x43b   :  { %924 = vst [vmem:[#allocation9 + $0x10] sm:$0xff] %v920_v13  ;;  %925 = vst [vmem:[#allocation9 + $0x18] sm:$0xff] %v921_v47 }
 0x43c   :  { %1522 = shalt.err (!%p1519_p0)
}
 0x43d   :  { %s1523_s12 = scalar_lea.hbm %s1835_s5, 512 }
 0x43e   :  { %p1524_p1 = scmp.ne.s32.totalorder %s1835_s5, %s1523_s12  ;;  %p1527_p2 = scmp.lt.u32.totalorder %s1523_s12, %s1835_s5 }
 0x440   :  { %p1529_p3 = pnand %p1527_p2, %p1524_p1 }
 0x442   :  { %1532 = shalt.err (!%p1529_p3)
}
 0x443   :  { %937 = dma.vmem_to_hbm [thread:$0]  %s932_s8, 512, %s1835_s5, [#allocation5], %s1541_s30, %s1541_s30, %s1542_s6  }
 0x444   :  { %1537 = dma.done.wait [#allocation5], 512  }
 0x445   :  { %1538 = vsyncadd [#allocation5], 4294966784 }
 0x446   :  { %941 = vsyncpa [#allocation4], 1 }
 0x447   :  { %942 = vsyncpa [#allocation7], 1 }
 0x448   :  { %943 = vsyncpa [#allocation5], 1 }

</bundles_post_ra>
